<compile_context>
chip_gen: v7x
topology: tpu7x:2x2x1
jax: 0.10.0
libtpu: 0.0.40
codegen_flags: <defaults>
</compile_context>

<pallas_src>
import functools

import jax
import jax.numpy as jnp
from jax.experimental import pallas as pl
from jax.experimental.pallas import tpu as pltpu


def _round_up(n: int, m: int) -> int:
    return -(-n // m) * m


def _pick_batch_tile(b: int) -> int:
    """Batch tile: big (overhead-amortizing), >=2 grid steps for large B, ~divides B."""
    tb = _round_up(b, 8)
    if tb <= 1024:          # small batch: single tile; megacore moot, overhead-bound anyway
        return tb
    n_tiles = max(2, -(-tb // 4096))          # cap per-tile rows at ~4096, >=2 tiles (v7x)
    return _round_up(-(-b // n_tiles), 8)     # near-divisor of B -> negligible partial block


def _fused_rowbias_kernel(x_ref, add_ref, w_ref, out_ref):
    """Fast path (1-row ob & prior): out = tanh(x @ W_x_fused + row_add)."""
    acc = jnp.dot(x_ref[...], w_ref[...], preferred_element_type=jnp.float32)  # (TB, H) f32
    out_ref[...] = jnp.tanh(acc + add_ref[...])  # (1, H) f32 row broadcasts implicitly


def _fused_ctx_kernel(x_ref, ob_ref, prior_ref, add_ref, wx_ref, wob_ref, wp_ref, out_ref):
    """General path: accumulate three dots (no concat, no explicit broadcast)."""
    acc = jnp.dot(x_ref[...], wx_ref[...], preferred_element_type=jnp.float32)
    acc = acc + jnp.dot(ob_ref[...], wob_ref[...], preferred_element_type=jnp.float32)
    acc = acc + jnp.dot(prior_ref[...], wp_ref[...], preferred_element_type=jnp.float32)
    out_ref[...] = jnp.tanh(acc + add_ref[...])


def init_params(key, x_dim, ob_dim, prior_embed_dim):
    """Deterministic synthetic parameters, PyTorch Linear convention (out, in)."""
    H = prior_embed_dim
    ks = jax.random.split(key, 6)
    return {
        "w_ob": jax.random.normal(ks[0], (H, ob_dim), jnp.float32) * 0.1,
        "b_ob": jax.random.normal(ks[1], (H,), jnp.float32) * 0.1,
        "w_x": jax.random.normal(ks[2], (H, x_dim), jnp.float32) * 0.1,
        "b_x": jax.random.normal(ks[3], (H,), jnp.float32) * 0.1,
        "w_m": jax.random.normal(ks[4], (H, 3 * H), jnp.float32) * 0.1,
        "b_m": jax.random.normal(ks[5], (H,), jnp.float32) * 0.1,
    }


@jax.jit
def context_cond_net_forward(t, x, prior_embed, ob_m, params):
    """Pallas implementation of ContextCondNet.forward.

    x:           (B, x_dim)
    prior_embed: (1, H) or (B, H)
    ob_m:        (1, ob_dim) or (B, ob_dim)
    returns:     (B, H) float32
    """
    del t  # t is unused by the reference forward pass
    ob = ob_m  # TODO(synk): ob_trans_func == identity (user-supplied in original)

    B, x_dim = x.shape
    ob_dim = ob.shape[1]
    H = params["w_x"].shape[0]
    f32, bf16 = jnp.float32, jnp.bfloat16

    # --- wrapper-side algebraic fusion (tiny; done in f32, exact up to reassoc) ---
    wm_t = params["w_m"].astype(f32).T                      # (3H, H)
    wm_x, wm_ob, wm_p = wm_t[:H], wm_t[H:2 * H], wm_t[2 * H:]
    w_x_fused = params["w_x"].astype(f32).T @ wm_x          # (x_dim, H)
    w_ob_fused = params["w_ob"].astype(f32).T @ wm_ob       # (ob_dim, H)
    bias = (params["b_m"].astype(f32)[None, :]
            + params["b_x"].astype(f32)[None, :] @ wm_x
            + params["b_ob"].astype(f32)[None, :] @ wm_ob)  # (1, H) f32

    x_b = x.astype(bf16)

    TB = _pick_batch_tile(B)
    grid = (pl.cdiv(B, TB),)   # partial final block handled by the pipeline; no jnp.pad of x
    cparams = pltpu.CompilerParams(dimension_semantics=("parallel",))

    if ob.shape[0] == 1 and prior_embed.shape[0] == 1:
        # Fast path: fold the entire 1-row context + biases into one f32 row.
        row_add = (bias
                   + ob.astype(f32) @ w_ob_fused
                   + prior_embed.astype(f32) @ wm_p)        # (1, H) f32
        return pl.pallas_call(
            _fused_rowbias_kernel,
            out_shape=jax.ShapeDtypeStruct((B, H), f32),
            grid=grid,
            in_specs=[
                pl.BlockSpec((TB, x_dim), lambda i: (i, 0)),   # x: tiled over batch (bf16)
                pl.BlockSpec((1, H), lambda i: (0, 0)),        # folded row bias (f32, resident)
                pl.BlockSpec((x_dim, H), lambda i: (0, 0)),    # fused weight (bf16, resident)
            ],
            out_specs=pl.BlockSpec((TB, H), lambda i: (i, 0)),
            compiler_params=cparams,
        )(x_b, row_add, w_x_fused.astype(bf16))

    # General path: ob and/or prior have B rows -> accumulate dots in-kernel.
    def _ctx_spec(arr, width):
        if arr.shape[0] == 1:
            return pl.BlockSpec((1, width), lambda i: (0, 0))   # resident 1-row context
        return pl.BlockSpec((TB, width), lambda i: (i, 0))      # tiled over batch

    return pl.pallas_call(
        _fused_ctx_kernel,
        out_shape=jax.ShapeDtypeStruct((B, H), f32),
        grid=grid,
        in_specs=[
            pl.BlockSpec((TB, x_dim), lambda i: (i, 0)),        # x
            _ctx_spec(ob, ob_dim),                              # ob
            _ctx_spec(prior_embed, H),                          # prior
            pl.BlockSpec((1, H), lambda i: (0, 0)),             # folded bias (f32, resident)
            pl.BlockSpec((x_dim, H), lambda i: (0, 0)),         # W_x_fused (bf16)
            pl.BlockSpec((ob_dim, H), lambda i: (0, 0)),        # W_ob_fused (bf16)
            pl.BlockSpec((H, H), lambda i: (0, 0)),             # W_prior (bf16)
        ],
        out_specs=pl.BlockSpec((TB, H), lambda i: (i, 0)),
        compiler_params=cparams,
    )(x_b, ob.astype(bf16), prior_embed.astype(bf16), bias,
      w_x_fused.astype(bf16), w_ob_fused.astype(bf16), wm_p.astype(bf16))


def _reference_forward(t, x, prior_embed, ob_m, params):
    """Pure-JAX f32 reference mirroring the PyTorch module semantics."""
    del t
    B = x.shape[0]
    ob = ob_m  # identity ob_trans_func
    embed_ob = ob @ params["w_ob"].T + params["b_ob"]
    embed_x = x @ params["w_x"].T + params["b_x"]
    if prior_embed.shape[0] == 1:
        prior_embed = jnp.repeat(prior_embed, B, axis=0)
    if embed_ob.shape[0] == 1:
        embed_ob = jnp.repeat(embed_ob, B, axis=0)
    merged = jnp.concatenate([embed_x, embed_ob, prior_embed], axis=-1)
    return jnp.tanh(merged @ params["w_m"].T + params["b_m"])


if __name__ == "__main__":
    # Small shapes consistent with the module's forward.
    B = 8             # batch (number of particles)
    X_DIM = 16        # x_dim
    OB_DIM = 8        # ob_dim
    H = 32            # prior_embed_dim

    key = jax.random.PRNGKey(0)
    k_p, k_x, k_ob, k_prior, k_ob2, k_prior2 = jax.random.split(key, 6)

    params = init_params(k_p, X_DIM, OB_DIM, H)
    x = jax.random.normal(k_x, (B, X_DIM), jnp.float32)
    t = jnp.float32(0.0)

    # --- fast path: 1-row ob / prior (broadcast case, as in the sampler loop) ---
    ob_m = jax.random.normal(k_ob, (1, OB_DIM), jnp.float32)
    prior_embed = jax.random.normal(k_prior, (1, H), jnp.float32)
    out = jax.block_until_ready(context_cond_net_forward(t, x, prior_embed, ob_m, params))
    ref = _reference_forward(t, x, prior_embed, ob_m, params)
    assert out.shape == (B, H)
    # bf16 operands with f32 accumulation: ~1e-3-level deviation vs the f32 reference.
    assert jnp.allclose(out, ref, atol=1e-2, rtol=1e-2), "mismatch vs reference (fast path)"

    # --- general path: per-row ob / prior (accumulating-dot kernel) ---
    ob_m_b = jax.random.normal(k_ob2, (B, OB_DIM), jnp.float32)
    prior_b = jax.random.normal(k_prior2, (B, H), jnp.float32)
    out_b = jax.block_until_ready(context_cond_net_forward(t, x, prior_b, ob_m_b, params))
    ref_b = _reference_forward(t, x, prior_b, ob_m_b, params)
    assert out_b.shape == (B, H)
    assert jnp.allclose(out_b, ref_b, atol=1e-2, rtol=1e-2), "mismatch vs reference (general path)"

    print("KERNEL_OK")
</pallas_src>

<mosaic_0001>
module attributes {stable_mosaic.version = 11 : i64} {
  func.func @_fused_rowbias_kernel(%arg0: i32, %arg1: memref<8x16xbf16, #tpu.memory_space<vmem>>, %arg2: memref<1x32xf32, #tpu.memory_space<vmem>>, %arg3: memref<16x32xbf16, #tpu.memory_space<vmem>>, %arg4: memref<8x32xf32, #tpu.memory_space<vmem>>) attributes {dimension_semantics = [#tpu.dimension_semantics<parallel>], iteration_bounds = array<i64: 1>, scalar_prefetch = 0 : i64, scratch_operands = 0 : i64, tpu.core_type = #tpu.core_type<tc>, window_params = [{transform_indices = @transform_0, window_bounds = array<i64: 8, 16>}, {pipeline_mode = #tpu.pipeline_mode<synchronous>, transform_indices = @transform_1, window_bounds = array<i64: 1, 32>}, {pipeline_mode = #tpu.pipeline_mode<synchronous>, transform_indices = @transform_2, window_bounds = array<i64: 16, 32>}, {transform_indices = @transform_3, window_bounds = array<i64: 8, 32>}]} {
    %c0 = arith.constant 0 : index
    %c0_0 = arith.constant 0 : index
    %0 = vector.load %arg1[%c0, %c0_0] : memref<8x16xbf16, #tpu.memory_space<vmem>>, vector<8x16xbf16>
    %c0_1 = arith.constant 0 : index
    %c0_2 = arith.constant 0 : index
    %1 = vector.load %arg3[%c0_1, %c0_2] : memref<16x32xbf16, #tpu.memory_space<vmem>>, vector<16x32xbf16>
    %cst = arith.constant dense<0.000000e+00> : vector<8x32xf32>
    %2 = tpu.matmul %0, %1, %cst {dimension_numbers = #tpu.dot_dimension_numbers<[1], [0], [0], [1], [0, 0, 1, 1], [], []>} : vector<8x16xbf16>, vector<16x32xbf16>, vector<8x32xf32> -> vector<8x32xf32>
    %c0_3 = arith.constant 0 : index
    %c0_4 = arith.constant 0 : index
    %3 = vector.load %arg2[%c0_3, %c0_4] : memref<1x32xf32, #tpu.memory_space<vmem>>, vector<1x32xf32>
    %4 = vector.broadcast %3 : vector<1x32xf32> to vector<8x32xf32>
    %5 = arith.addf %2, %4 : vector<8x32xf32>
    %6 = math.tanh %5 : vector<8x32xf32>
    %c0_5 = arith.constant 0 : index
    %c0_6 = arith.constant 0 : index
    %7 = vector.load %arg4[%c0_5, %c0_6] : memref<8x32xf32, #tpu.memory_space<vmem>>, vector<8x32xf32>
    tpu.vector_store %arg4[%c0_5, %c0_6], %6 {strides = array<i32>} : memref<8x32xf32, #tpu.memory_space<vmem>>, vector<8x32xf32>,
    return
  }
  func.func @transform_0(%arg0: i32) -> (i32, i32) {
    %c0_i32 = arith.constant 0 : i32
    %c0_i32_0 = arith.constant 0 : i32
    return %arg0, %c0_i32 : i32, i32
  }
  func.func @transform_1(%arg0: i32) -> (i32, i32) {
    %c0_i32 = arith.constant 0 : i32
    %c0_i32_0 = arith.constant 0 : i32
    %c0_i32_1 = arith.constant 0 : i32
    return %c0_i32, %c0_i32_0 : i32, i32
  }
  func.func @transform_2(%arg0: i32) -> (i32, i32) {
    %c0_i32 = arith.constant 0 : i32
    %c0_i32_0 = arith.constant 0 : i32
    %c0_i32_1 = arith.constant 0 : i32
    return %c0_i32, %c0_i32_0 : i32, i32
  }
  func.func @transform_3(%arg0: i32) -> (i32, i32) {
    %c0_i32 = arith.constant 0 : i32
    %c0_i32_0 = arith.constant 0 : i32
    return %arg0, %c0_i32 : i32, i32
  }
}

</mosaic_0001>

<bundles_post_ra>
// kernel: context_cond_net_forward.1
= control target key start
LH: loop header
LB: loop body
LE: loop exit
PB: predicated region body
PF: predicated region fallthrough
CT: control target
= control target key end

     0   :  { %v134_v1 = vmov 0.0   ;;  %vm135_vm0 = vmmov 0   ;;  %vm32_vm1 = vcmask 130048   ;;  %s178_s0 = inlined_call_operand.vmem [shape: bf16[8,16], index: 0, kind: input, shape index: {}]   ;;  %s179_s1 = inlined_call_operand.vmem [shape: f32[1,32], index: 1, kind: input, shape index: {}]   ;;  %s180_s2 = inlined_call_operand.vmem [shape: bf16[16,32], index: 2, kind: input, shape index: {}]   ;;  %s181_s3 = inlined_call_operand.hbm [shape: f32[8,32], index: 3, kind: output, shape index: {}]  }
   0x1   :  { %v107_v0 = vld [vmem:[%s180_s2] sm:$0xff]   ;;  %98 = vmatprep.subr.bf16.mxu0 %v134_v1  ;;  %100 = vmatprep.mubr.msk.bf16.mxu0 %vm135_vm0, %v134_v1 }
   0x2   :  { %99 = vmatpush3.bf16.msra.mxu0 %v107_v0  ;;  %v16_v2 = vld [vmem:[%s178_s0] sm:$0xf] }
   0x3   :  { %8 = vsyncpa [#allocation3], 0  ;;  %v93_v3 = vld [vmem:[%s179_s1] ss:$0 sm:$0xff]  ;;  %s136_s2 = smov [#allocation2]   ;;  %vm77_vm2 = vcmask 261120  }
   0x4   :  { %s85_s18 = sshll.u32 %s136_s2, 4  ;;  %s86_s18 = int_to_ptr.vmem [resolvable:$true] %s85_s18 }
   0x5   :  { %101 = vmatmul.mubr.msk.bf16.vlgmr.msra.gmra.mrb[0].mxu0 %vm32_vm1, %v16_v2  ;;  %s110_s0 = scalar_lea.vmem %s86_s18, 128  ;;  %p115_p1 = scmp.lt.s32.totalorder %s86_s18, %s86_s18 }
   0x6   :  { %p111_p0 = scmp.ne.s32.totalorder %s86_s18, %s110_s0  ;;  %p116_p2 = scmp.lt.s32.totalorder %s110_s0, %s110_s0 }
   0x8   :  { %p117_p3 = por %p116_p2, %p115_p1 }
   0xa   :  { %p118_p4 = pnand %p117_p3, %p111_p0 }
  0xd8   :  { %v70_v4 = vpop.f32.mrb[0].mxu0 }
  0xd9   :  { %v71_v5 = vadd.f32 %v93_v3, %v70_v4  ;;  %v102_v6 = vpop.f32.mrb[1].mxu0 }
  0xda   :  { %v73_v7 = vpop.f32.mrb[2].mxu0 }
  0xdb   :  { %108 = vtanh.f32 %v71_v5  ;;  %v103_v8 = vpop.f32.mrb[3].mxu0 }
  0xe5   :  { %v109_v9 = vpop.eup %108 }
  0xe6   :  { %78 = vst.msk [vmem:[#allocation2] sm:$0xff] %vm77_vm2, %v109_v9 }
  0xe7   :  { %121 = shalt.err (!%p118_p4)
}
  0xe8   :  { %s122_s20 = scalar_lea.hbm %s181_s3, 128 }
  0xe9   :  { %p123_p5 = scmp.ne.s32.totalorder %s181_s3, %s122_s20  ;;  %p126_p6 = scmp.lt.u32.totalorder %s122_s20, %s181_s3 }
  0xeb   :  { %p128_p7 = pnand %p126_p6, %p123_p5 }
  0xed   :  { %131 = shalt.err (!%p128_p7)
}
  0xee   :  { %88 = dma.vmem_to_hbm [thread:$0]  %s86_s18, 128, %s181_s3, [#allocation3]  }
  0xef   :  { %132 = dma.done.wait [#allocation3], 128  }
  0xf0   :  { %133 = vsyncadd [#allocation3], 4294967168 }
  0xf1   :  { %92 = vsyncpa [#allocation3], 1 }

</bundles_post_ra>
